<compile_context>
chip_gen: v6e
topology: v6e:2x2x1
jax: 0.10.0
libtpu: 0.0.40
codegen_flags: <defaults>
</compile_context>

<pallas_src>
import functools

import jax
import jax.numpy as jnp
from jax.experimental import pallas as pl
from jax.experimental.pallas import tpu as pltpu


def _round_up(n, m):
    return ((n + m - 1) // m) * m


def _cdiv(a, b):
    return (a + b - 1) // b


def _mlp(x, w1_ref, b1_ref, w2_ref, b2_ref, w3_ref, b3_ref):
    """Fused 2-hidden-layer ReLU MLP on a batch tile (all weights VMEM-resident)."""
    h1 = jnp.maximum(
        jnp.dot(x, w1_ref[...], preferred_element_type=jnp.float32) + b1_ref[...], 0.0)
    h2 = jnp.maximum(
        jnp.dot(h1, w2_ref[...], preferred_element_type=jnp.float32) + b2_ref[...], 0.0)
    y = jnp.dot(h2, w3_ref[...], preferred_element_type=jnp.float32) + b3_ref[...]
    return y


# --------------------------------------------------------------------------------------
# Kernels
# --------------------------------------------------------------------------------------

def _mlp_kernel(x_ref, w1_ref, b1_ref, w2_ref, b2_ref, w3_ref, b3_ref,
                *rest, has_noise: bool):
    """Continuous-action path: MLP (+ optional noise) on one batch tile."""
    if has_noise:
        noise_ref, y_ref = rest
    else:
        (y_ref,) = rest
    y = _mlp(x_ref[...], w1_ref, b1_ref, w2_ref, b2_ref, w3_ref, b3_ref)
    if has_noise:
        y = y + noise_ref[...]
    y_ref[...] = y.astype(y_ref.dtype)


def _mlp_softmax_kernel(x_ref, w1_ref, b1_ref, w2_ref, b2_ref, w3_ref, b3_ref,
                        *rest, has_noise: bool, batch: int, tile_rows: int):
    """Discrete-action path, whole batch in one tile: MLP (+noise) + softmax over dim=0."""
    if has_noise:
        noise_ref, y_ref = rest
    else:
        (y_ref,) = rest
    y = _mlp(x_ref[...], w1_ref, b1_ref, w2_ref, b2_ref, w3_ref, b3_ref)
    if has_noise:
        y = y + noise_ref[...]
    # Mask padded / out-of-range rows so they don't pollute the batch-axis softmax.
    rows = jax.lax.broadcasted_iota(jnp.int32, (tile_rows, 1), 0)
    ys = jnp.where(rows < batch, y, -jnp.inf)
    m = jnp.max(ys, axis=0, keepdims=True)
    e = jnp.exp(ys - m)
    denom = jnp.sum(e, axis=0, keepdims=True)
    y_ref[...] = (e / denom).astype(y_ref.dtype)  # exact divide: probs sum to 1


def _mlp_stats_kernel(x_ref, w1_ref, b1_ref, w2_ref, b2_ref, w3_ref, b3_ref,
                      *rest, has_noise: bool, batch: int, tile_rows: int):
    """Discrete path pass 1 (tiled): MLP (+noise) tile + online per-column max / exp-sum."""
    if has_noise:
        noise_ref, y_ref, m_ref, l_ref = rest
    else:
        y_ref, m_ref, l_ref = rest
    i = pl.program_id(0)

    @pl.when(i == 0)
    def _():
        m_ref[...] = jnp.full_like(m_ref, -jnp.inf)
        l_ref[...] = jnp.zeros_like(l_ref)

    y = _mlp(x_ref[...], w1_ref, b1_ref, w2_ref, b2_ref, w3_ref, b3_ref)
    if has_noise:
        y = y + noise_ref[...]
    y_ref[...] = y.astype(y_ref.dtype)

    rows = jax.lax.broadcasted_iota(jnp.int32, (tile_rows, 1), 0) + i * tile_rows
    ys = jnp.where(rows < batch, y, -jnp.inf)
    m_old = m_ref[...]
    m_new = jnp.maximum(m_old, jnp.max(ys, axis=0, keepdims=True))
    l_ref[...] = (l_ref[...] * jnp.exp(m_old - m_new)
                  + jnp.sum(jnp.exp(ys - m_new), axis=0, keepdims=True))
    m_ref[...] = m_new


def _softmax_norm_kernel(y_ref, m_ref, l_ref, o_ref):
    """Discrete path pass 2 (tiled): normalize y with the final column stats."""
    o_ref[...] = (jnp.exp(y_ref[...] - m_ref[...]) / l_ref[...]).astype(o_ref.dtype)


# --------------------------------------------------------------------------------------
# Wrapper
# --------------------------------------------------------------------------------------

def _choose_tile(B, batch_tile):
    tm = min(batch_tile, _round_up(max(B, 1), 8))
    # Prefer >= 2 tiles when possible so v7x's two TensorCores are both used.
    if B > 8:
        tm = min(tm, _round_up(_cdiv(B, 2), 8))
    return max(tm, 8)


def policy_forward(x, params, noise=None, discrete_action=False, batch_tile=512):
    """JAX wrapper around the fused Pallas kernels.

    x:      [B, D_in] float32
    params: dict with w1[D_in,H], b1[1,H], w2[H,H], b2[1,H], w3[H,A], b3[1,A]
    noise:  optional [B, A] float32
    """
    x = x.astype(jnp.float32)
    B, D_in = x.shape
    H = params["w1"].shape[1]
    A = params["w3"].shape[1]
    has_noise = noise is not None

    tm = _choose_tile(B, batch_tile)
    T = _cdiv(B, tm)

    weights = [params["w1"], params["b1"], params["w2"],
               params["b2"], params["w3"], params["b3"]]
    weights = [jnp.asarray(w, jnp.float32) for w in weights]
    inputs = [x] + weights
    if has_noise:
        inputs.append(jnp.asarray(noise, jnp.float32))

    # x / noise / y tiled over batch; weights full-dim, grid-invariant (VMEM-resident).
    x_spec = pl.BlockSpec((tm, D_in), lambda i: (i, 0))
    w_specs = [
        pl.BlockSpec((D_in, H), lambda i: (0, 0)),
        pl.BlockSpec((1, H), lambda i: (0, 0)),
        pl.BlockSpec((H, H), lambda i: (0, 0)),
        pl.BlockSpec((1, H), lambda i: (0, 0)),
        pl.BlockSpec((H, A), lambda i: (0, 0)),
        pl.BlockSpec((1, A), lambda i: (0, 0)),
    ]
    in_specs = [x_spec] + w_specs
    if has_noise:
        in_specs.append(pl.BlockSpec((tm, A), lambda i: (i, 0)))
    y_spec = pl.BlockSpec((tm, A), lambda i: (i, 0))
    stat_spec = pl.BlockSpec((1, A), lambda i: (0, 0))

    cparams = functools.partial(pltpu.CompilerParams, vmem_limit_bytes=32 << 20)

    if not discrete_action:
        kernel = functools.partial(_mlp_kernel, has_noise=has_noise)
        return pl.pallas_call(
            kernel,
            out_shape=jax.ShapeDtypeStruct((B, A), jnp.float32),
            grid_spec=pltpu.PrefetchScalarGridSpec(
                num_scalar_prefetch=0, grid=(T,),
                in_specs=in_specs, out_specs=y_spec),
            compiler_params=cparams(dimension_semantics=("parallel",)),
        )(*inputs)

    if T == 1:
        # Whole batch fits one tile: fused MLP + masked softmax(dim=0).
        kernel = functools.partial(_mlp_softmax_kernel, has_noise=has_noise,
                                   batch=B, tile_rows=tm)
        return pl.pallas_call(
            kernel,
            out_shape=jax.ShapeDtypeStruct((B, A), jnp.float32),
            grid_spec=pltpu.PrefetchScalarGridSpec(
                num_scalar_prefetch=0, grid=(T,),
                in_specs=in_specs, out_specs=y_spec),
            compiler_params=cparams(dimension_semantics=("arbitrary",)),
        )(*inputs)

    # Two-pass batch-tiled softmax over dim=0 (required: softmax couples all rows).
    stats_kernel = functools.partial(_mlp_stats_kernel, has_noise=has_noise,
                                     batch=B, tile_rows=tm)
    y, m, l = pl.pallas_call(
        stats_kernel,
        out_shape=(jax.ShapeDtypeStruct((B, A), jnp.float32),
                   jax.ShapeDtypeStruct((1, A), jnp.float32),
                   jax.ShapeDtypeStruct((1, A), jnp.float32)),
        grid_spec=pltpu.PrefetchScalarGridSpec(
            num_scalar_prefetch=0, grid=(T,),
            in_specs=in_specs,
            out_specs=(y_spec, stat_spec, stat_spec)),
        compiler_params=cparams(dimension_semantics=("arbitrary",)),
    )(*inputs)

    return pl.pallas_call(
        _softmax_norm_kernel,
        out_shape=jax.ShapeDtypeStruct((B, A), jnp.float32),
        grid_spec=pltpu.PrefetchScalarGridSpec(
            num_scalar_prefetch=0, grid=(T,),
            in_specs=[y_spec, stat_spec, stat_spec],
            out_specs=y_spec),
        compiler_params=cparams(dimension_semantics=("parallel",)),
    )(y, m, l)


# --------------------------------------------------------------------------------------
# Reference + test harness
# --------------------------------------------------------------------------------------

def _init_params(key, d_in, h, a_dim):
    """Deterministic synthetic parameter init (PyTorch-Linear-like uniform)."""
    ks = jax.random.split(key, 6)

    def lin(kw, kb, fan_in, fan_out):
        bound = 1.0 / jnp.sqrt(fan_in)
        w = jax.random.uniform(kw, (fan_in, fan_out), jnp.float32, -bound, bound)
        b = jax.random.uniform(kb, (1, fan_out), jnp.float32, -bound, bound)
        return w, b

    w1, b1 = lin(ks[0], ks[1], d_in, h)
    w2, b2 = lin(ks[2], ks[3], h, h)
    w3, b3 = lin(ks[4], ks[5], h, a_dim)
    return {"w1": w1, "b1": b1, "w2": w2, "b2": b2, "w3": w3, "b3": b3}


def _reference_forward(x, p, noise, discrete_action):
    h1 = jnp.maximum(x @ p["w1"] + p["b1"], 0.0)
    h2 = jnp.maximum(h1 @ p["w2"] + p["b2"], 0.0)
    y = h2 @ p["w3"] + p["b3"]
    if noise is not None:
        y = y + noise
    if discrete_action:
        y = jax.nn.softmax(y, axis=0)
    return y


if __name__ == "__main__":
    # Small shapes consistent with Policy(x_dim=(32,), a_dim=8, policy_h_dim=32)
    B, D_IN, H, A_DIM = 2, 32, 32, 8

    key = jax.random.PRNGKey(0)
    k_param, k_x, k_noise, k_x2, k_x3, k_n3 = jax.random.split(key, 6)

    params = _init_params(k_param, D_IN, H, A_DIM)
    x = jax.random.normal(k_x, (B, D_IN), dtype=jnp.float32)
    noise = 0.1 * jax.random.normal(k_noise, (B, A_DIM), dtype=jnp.float32)

    # Case 1: discrete-action path (softmax over dim=0), with noise, single fused tile.
    y = jax.block_until_ready(policy_forward(x, params, noise=noise, discrete_action=True))
    y_ref = _reference_forward(x, params, noise, True)
    assert y.shape == (B, A_DIM)
    assert jnp.allclose(y, y_ref, atol=1e-4, rtol=1e-3), "mismatch (discrete, fused)"

    # Case 2: continuous-action path, no noise, batch-tiled grid (2 tiles).
    B2 = 512
    x2 = jax.random.normal(k_x2, (B2, D_IN), dtype=jnp.float32)
    y2 = jax.block_until_ready(policy_forward(x2, params, noise=None, discrete_action=False))
    y2_ref = _reference_forward(x2, params, None, False)
    assert y2.shape == (B2, A_DIM)
    assert jnp.allclose(y2, y2_ref, atol=1e-4, rtol=1e-4), "mismatch (continuous, tiled)"

    # Case 3: discrete-action path, non-divisible batch, with noise -> two-pass tiled softmax.
    B3 = 300
    x3 = jax.random.normal(k_x3, (B3, D_IN), dtype=jnp.float32)
    n3 = 0.1 * jax.random.normal(k_n3, (B3, A_DIM), dtype=jnp.float32)
    y3 = jax.block_until_ready(policy_forward(x3, params, noise=n3, discrete_action=True))
    y3_ref = _reference_forward(x3, params, n3, True)
    assert y3.shape == (B3, A_DIM)
    assert jnp.allclose(y3, y3_ref, atol=1e-4, rtol=1e-3), "mismatch (discrete, two-pass)"

    print("KERNEL_OK")
</pallas_src>

<mosaic_0001>
module attributes {stable_mosaic.version = 11 : i64} {
  func.func @_mlp_softmax_kernel(%arg0: i32, %arg1: memref<8x32xf32, #tpu.memory_space<vmem>>, %arg2: memref<32x32xf32, #tpu.memory_space<vmem>>, %arg3: memref<1x32xf32, #tpu.memory_space<vmem>>, %arg4: memref<32x32xf32, #tpu.memory_space<vmem>>, %arg5: memref<1x32xf32, #tpu.memory_space<vmem>>, %arg6: memref<32x8xf32, #tpu.memory_space<vmem>>, %arg7: memref<1x8xf32, #tpu.memory_space<vmem>>, %arg8: memref<8x8xf32, #tpu.memory_space<vmem>>, %arg9: memref<8x8xf32, #tpu.memory_space<vmem>>) attributes {dimension_semantics = [#tpu.dimension_semantics<arbitrary>], iteration_bounds = array<i64: 1>, scalar_prefetch = 0 : i64, scratch_operands = 0 : i64, tpu.core_type = #tpu.core_type<tc>, window_params = [{transform_indices = @transform_0, window_bounds = array<i64: 8, 32>}, {pipeline_mode = #tpu.pipeline_mode<synchronous>, transform_indices = @transform_1, window_bounds = array<i64: 32, 32>}, {pipeline_mode = #tpu.pipeline_mode<synchronous>, transform_indices = @transform_2, window_bounds = array<i64: 1, 32>}, {pipeline_mode = #tpu.pipeline_mode<synchronous>, transform_indices = @transform_3, window_bounds = array<i64: 32, 32>}, {pipeline_mode = #tpu.pipeline_mode<synchronous>, transform_indices = @transform_4, window_bounds = array<i64: 1, 32>}, {pipeline_mode = #tpu.pipeline_mode<synchronous>, transform_indices = @transform_5, window_bounds = array<i64: 32, 8>}, {pipeline_mode = #tpu.pipeline_mode<synchronous>, transform_indices = @transform_6, window_bounds = array<i64: 1, 8>}, {transform_indices = @transform_7, window_bounds = array<i64: 8, 8>}, {transform_indices = @transform_8, window_bounds = array<i64: 8, 8>}]} {
    %c0 = arith.constant 0 : index
    %c0_0 = arith.constant 0 : index
    %0 = vector.load %arg1[%c0, %c0_0] : memref<8x32xf32, #tpu.memory_space<vmem>>, vector<8x32xf32>
    %c0_1 = arith.constant 0 : index
    %c0_2 = arith.constant 0 : index
    %1 = vector.load %arg2[%c0_1, %c0_2] : memref<32x32xf32, #tpu.memory_space<vmem>>, vector<32x32xf32>
    %cst = arith.constant dense<0.000000e+00> : vector<8x32xf32>
    %2 = tpu.matmul %0, %1, %cst {dimension_numbers = #tpu.dot_dimension_numbers<[1], [0], [0], [1], [0, 0, 1, 1], [], []>} : vector<8x32xf32>, vector<32x32xf32>, vector<8x32xf32> -> vector<8x32xf32>
    %c0_3 = arith.constant 0 : index
    %c0_4 = arith.constant 0 : index
    %3 = vector.load %arg3[%c0_3, %c0_4] : memref<1x32xf32, #tpu.memory_space<vmem>>, vector<1x32xf32>
    %4 = vector.broadcast %3 : vector<1x32xf32> to vector<8x32xf32>
    %5 = arith.addf %2, %4 : vector<8x32xf32>
    %cst_5 = arith.constant 0.000000e+00 : f32
    %6 = vector.broadcast %cst_5 : f32 to vector<8x32xf32>
    %7 = arith.maximumf %5, %6 : vector<8x32xf32>
    %c0_6 = arith.constant 0 : index
    %c0_7 = arith.constant 0 : index
    %8 = vector.load %arg4[%c0_6, %c0_7] : memref<32x32xf32, #tpu.memory_space<vmem>>, vector<32x32xf32>
    %cst_8 = arith.constant dense<0.000000e+00> : vector<8x32xf32>
    %9 = tpu.matmul %7, %8, %cst_8 {dimension_numbers = #tpu.dot_dimension_numbers<[1], [0], [0], [1], [0, 0, 1, 1], [], []>} : vector<8x32xf32>, vector<32x32xf32>, vector<8x32xf32> -> vector<8x32xf32>
    %c0_9 = arith.constant 0 : index
    %c0_10 = arith.constant 0 : index
    %10 = vector.load %arg5[%c0_9, %c0_10] : memref<1x32xf32, #tpu.memory_space<vmem>>, vector<1x32xf32>
    %11 = vector.broadcast %10 : vector<1x32xf32> to vector<8x32xf32>
    %12 = arith.addf %9, %11 : vector<8x32xf32>
    %cst_11 = arith.constant 0.000000e+00 : f32
    %13 = vector.broadcast %cst_11 : f32 to vector<8x32xf32>
    %14 = arith.maximumf %12, %13 : vector<8x32xf32>
    %c0_12 = arith.constant 0 : index
    %c0_13 = arith.constant 0 : index
    %15 = vector.load %arg6[%c0_12, %c0_13] : memref<32x8xf32, #tpu.memory_space<vmem>>, vector<32x8xf32>
    %cst_14 = arith.constant dense<0.000000e+00> : vector<8x8xf32>
    %16 = tpu.matmul %14, %15, %cst_14 {dimension_numbers = #tpu.dot_dimension_numbers<[1], [0], [0], [1], [0, 0, 1, 1], [], []>} : vector<8x32xf32>, vector<32x8xf32>, vector<8x8xf32> -> vector<8x8xf32>
    %c0_15 = arith.constant 0 : index
    %c0_16 = arith.constant 0 : index
    %17 = vector.load %arg7[%c0_15, %c0_16] : memref<1x8xf32, #tpu.memory_space<vmem>>, vector<1x8xf32>
    %18 = vector.broadcast %17 : vector<1x8xf32> to vector<8x8xf32>
    %19 = arith.addf %16, %18 : vector<8x8xf32>
    %c0_17 = arith.constant 0 : index
    %c0_18 = arith.constant 0 : index
    %20 = vector.load %arg8[%c0_17, %c0_18] : memref<8x8xf32, #tpu.memory_space<vmem>>, vector<8x8xf32>
    %21 = arith.addf %19, %20 : vector<8x8xf32>
    %22 = tpu.iota {dimensions = array<i32: 0>} : vector<8x1xi32>
    %c2_i32 = arith.constant 2 : i32
    %23 = vector.broadcast %c2_i32 : i32 to vector<8x1xi32>
    %24 = arith.cmpi slt, %22, %23 : vector<8x1xi32>
    %cst_19 = arith.constant 0xFF800000 : f32
    %25 = vector.shape_cast %24 : vector<8x1xi1> to vector<8x1xi1>
    %26 = vector.broadcast %25 : vector<8x1xi1> to vector<8x8xi1>
    %27 = vector.broadcast %cst_19 : f32 to vector<8x8xf32>
    %28 = arith.select %26, %21, %27 : vector<8x8xi1>, vector<8x8xf32>
    %cst_20 = arith.constant dense<0xFF800000> : vector<8xf32>
    %29 = vector.multi_reduction <maximumf>, %28, %cst_20 [0] : vector<8x8xf32> to vector<8xf32>
    %30 = vector.shape_cast %29 : vector<8xf32> to vector<1x8xf32>
    %31 = vector.broadcast %30 : vector<1x8xf32> to vector<8x8xf32>
    %32 = arith.subf %28, %31 : vector<8x8xf32>
    %33 = math.exp %32 : vector<8x8xf32>
    %cst_21 = arith.constant dense<0.000000e+00> : vector<8xf32>
    %34 = vector.multi_reduction <add>, %33, %cst_21 [0] : vector<8x8xf32> to vector<8xf32>
    %35 = vector.shape_cast %34 : vector<8xf32> to vector<1x8xf32>
    %36 = vector.broadcast %35 : vector<1x8xf32> to vector<8x8xf32>
    %37 = arith.divf %33, %36 : vector<8x8xf32>
    %c0_22 = arith.constant 0 : index
    %c0_23 = arith.constant 0 : index
    %38 = vector.load %arg9[%c0_22, %c0_23] : memref<8x8xf32, #tpu.memory_space<vmem>>, vector<8x8xf32>
    tpu.vector_store %arg9[%c0_22, %c0_23], %37 {strides = array<i32>} : memref<8x8xf32, #tpu.memory_space<vmem>>, vector<8x8xf32>,
    return
  }
  func.func @transform_0(%arg0: i32) -> (i32, i32) {
    %c0_i32 = arith.constant 0 : i32
    %c0_i32_0 = arith.constant 0 : i32
    return %arg0, %c0_i32 : i32, i32
  }
  func.func @transform_1(%arg0: i32) -> (i32, i32) {
    %c0_i32 = arith.constant 0 : i32
    %c0_i32_0 = arith.constant 0 : i32
    %c0_i32_1 = arith.constant 0 : i32
    return %c0_i32, %c0_i32_0 : i32, i32
  }
  func.func @transform_2(%arg0: i32) -> (i32, i32) {
    %c0_i32 = arith.constant 0 : i32
    %c0_i32_0 = arith.constant 0 : i32
    %c0_i32_1 = arith.constant 0 : i32
    return %c0_i32, %c0_i32_0 : i32, i32
  }
  func.func @transform_3(%arg0: i32) -> (i32, i32) {
    %c0_i32 = arith.constant 0 : i32
    %c0_i32_0 = arith.constant 0 : i32
    %c0_i32_1 = arith.constant 0 : i32
    return %c0_i32, %c0_i32_0 : i32, i32
  }
  func.func @transform_4(%arg0: i32) -> (i32, i32) {
    %c0_i32 = arith.constant 0 : i32
    %c0_i32_0 = arith.constant 0 : i32
    %c0_i32_1 = arith.constant 0 : i32
    return %c0_i32, %c0_i32_0 : i32, i32
  }
  func.func @transform_5(%arg0: i32) -> (i32, i32) {
    %c0_i32 = arith.constant 0 : i32
    %c0_i32_0 = arith.constant 0 : i32
    %c0_i32_1 = arith.constant 0 : i32
    return %c0_i32, %c0_i32_0 : i32, i32
  }
  func.func @transform_6(%arg0: i32) -> (i32, i32) {
    %c0_i32 = arith.constant 0 : i32
    %c0_i32_0 = arith.constant 0 : i32
    %c0_i32_1 = arith.constant 0 : i32
    return %c0_i32, %c0_i32_0 : i32, i32
  }
  func.func @transform_7(%arg0: i32) -> (i32, i32) {
    %c0_i32 = arith.constant 0 : i32
    %c0_i32_0 = arith.constant 0 : i32
    return %arg0, %c0_i32 : i32, i32
  }
  func.func @transform_8(%arg0: i32) -> (i32, i32) {
    %c0_i32 = arith.constant 0 : i32
    %c0_i32_0 = arith.constant 0 : i32
    return %arg0, %c0_i32 : i32, i32
  }
}

</mosaic_0001>

<bundles_post_ra>
// kernel: tpu_custom_call.1
= control target key start
LH: loop header
LB: loop body
LE: loop exit
PB: predicated region body
PF: predicated region fallthrough
CT: control target
= control target key end

     0   :  { %13 = vsyncpa [#allocation3], 0  ;;  %s563_s0 = inlined_call_operand.vmem [shape: f32[2,32], index: 0, kind: input, shape index: {}]   ;;  %s564_s1 = inlined_call_operand.vmem [shape: f32[32,32], index: 1, kind: input, shape index: {}]   ;;  %s565_s2 = inlined_call_operand.vmem [shape: f32[1,32], index: 2, kind: input, shape index: {}]   ;;  %s566_s3 = inlined_call_operand.hbm [shape: f32[32,32], index: 3, kind: input, shape index: {}]   ;;  %s567_s4 = inlined_call_operand.vmem [shape: f32[1,32], index: 4, kind: input, shape index: {}]   ;;  %s568_s5 = inlined_call_operand.vmem [shape: f32[32,8], index: 5, kind: input, shape index: {}]   ;;  %s569_s6 = inlined_call_operand.vmem [shape: f32[1,8], index: 6, kind: input, shape index: {}]   ;;  %s570_s7 = inlined_call_operand.vmem [shape: f32[2,8], index: 7, kind: input, shape index: {}]   ;;  %s571_s8 = inlined_call_operand.hbm [shape: f32[2,8], index: 8, kind: output, shape index: {}]  }
   0x1   :  { %14 = vsyncpa [#allocation4], 0  ;;  %s456_s27 = smov [#allocation2]  }
   0x2   :  { %s26_s28 = sshll.u32 %s456_s27, 4  ;;  %s27_s28 = int_to_ptr.vmem [resolvable:$true] %s26_s28 }
   0x3   :  { %s420_s29 = scalar_lea.vmem %s27_s28, 512  ;;  %p425_p1 = scmp.lt.s32.totalorder %s27_s28, %s27_s28 }
   0x4   :  { %p421_p0 = scmp.ne.s32.totalorder %s27_s28, %s420_s29  ;;  %p426_p2 = scmp.lt.s32.totalorder %s420_s29, %s420_s29 }
   0x6   :  { %p427_p3 = por %p426_p2, %p425_p1 }
   0x8   :  { %p428_p4 = pnand %p427_p3, %p421_p0 }
   0xa   :  { %431 = shalt.err (!%p428_p4)
}
   0xb   :  { %s457_s30 = smov 128   ;;  %s458_s9 = smov 8  }
   0xc   :  { %32 = dma.hbm_to_vmem [thread:$0]  %s566_s3, 512, %s27_s28, [#allocation3], %s457_s30, %s457_s30, %s458_s9  }
   0xd   :  { %452 = dma.done.wait [#allocation3], 512  }
   0xe   :  { %453 = vsyncadd [#allocation3], 4294966784  ;;  %v459_v0 = vmov 0.0   ;;  %vm460_vm0 = vmmov 0   ;;  %v48_v1 = vld [vmem:[%s564_s1 + $0x18] sm:$0xff]  ;;  %v47_v2 = vld [vmem:[%s564_s1 + $0x10] sm:$0xff]  ;;  %v302_v24 = vlaneseq }
   0xf   :  { %367 = vmatprep.subr.mxu0 %v459_v0  ;;  %375 = vmatprep.mubr.msk.f32.mxu0 %vm460_vm0, %v459_v0  ;;  %v134_v3 = vld [vmem:[#allocation2 + $0x18] sm:$0xff]  ;;  %v46_v4 = vld [vmem:[%s564_s1 + $0x8] sm:$0xff]  ;;  %v45_v5 = vld [vmem:[%s564_s1] sm:$0xff]  ;;  %vm56_vm1 = vcmask 261120   ;;  %vm308_vm3 = vcmask 64512  }
  0x10   :  { %378 = vmatprep.subr.mxu1 %v459_v0  ;;  %386 = vmatprep.mubr.msk.f32.mxu1 %vm460_vm0, %v459_v0  ;;  %v44_v6 = vld [vmem:[%s563_s0] sm:$0xff]  ;;  %v133_v7 = vld [vmem:[#allocation2 + $0x10] sm:$0xff]  ;;  %v132_v8 = vld [vmem:[#allocation2 + $0x8] sm:$0xff]  ;;  %v303_v26 = vshrl.u32 %v302_v24, 7 }
  0x11   :  { %368 = vmatpush3.msra.mxu0 %v48_v1  ;;  %379 = vmatpush3.msra.mxu1 %v134_v3  ;;  %v131_v9 = vld [vmem:[#allocation2] sm:$0xff]  ;;  %v219_v10 = vld [vmem:[%s568_s5 + $0x18] sm:$0xff]  ;;  %v218_v16 = vld [vmem:[%s568_s5 + $0x10] sm:$0xff] }
  0x12   :  { %369 = vmatprep.subr.mxu0 %v459_v0  ;;  %380 = vmatprep.subr.mxu1 %v459_v0  ;;  %v346_v11 = vld [vmem:[%s565_s2] ss:$0 sm:$0xff]  ;;  %v217_v17 = vld [vmem:[%s568_s5 + $0x8] sm:$0xff]  ;;  %vm304_vm2 = vcmp.lt.s32.totalorder %v303_v26, 2 }
  0x13   :  { %370 = vmatpush3.msra.mxu0 %v47_v2  ;;  %381 = vmatpush3.msra.mxu1 %v133_v7  ;;  %v216_v18 = vld [vmem:[%s568_s5] sm:$0xff] }
  0x14   :  { %371 = vmatprep.subr.mxu0 %v459_v0  ;;  %382 = vmatprep.subr.mxu1 %v459_v0  ;;  %v348_v19 = vld [vmem:[%s567_s4] ss:$0 sm:$0xff] }
  0x15   :  { %372 = vmatpush3.msra.mxu0 %v46_v4  ;;  %383 = vmatpush3.msra.mxu1 %v132_v8  ;;  %v350_v25 = vld [vmem:[%s569_s6] ss:$0 sm:$0xff] }
  0x16   :  { %373 = vmatprep.subr.mxu0 %v459_v0  ;;  %384 = vmatprep.subr.mxu1 %v459_v0  ;;  %v300_v28 = vld [vmem:[%s570_s7] sm:$0xff] }
  0x17   :  { %374 = vmatpush3.msra.mxu0 %v45_v5  ;;  %385 = vmatpush3.msra.mxu1 %v131_v9 }
  0x18   :  { %376 = vmatmul.mubr.msk.f32.vlgmr.msra.gmra.mxu0 %vm56_vm1, %v44_v6  ;;  %389 = vmatprep.subr.mxu0 %v459_v0 }
  0x19   :  { %397 = vmatprep.mubr.msk.f32.mxu0 %vm460_vm0, %v459_v0  ;;  %390 = vmatpush3.msra.mxu0 %v219_v10 }
  0x1a   :  { %391 = vmatprep.subr.mxu0 %v459_v0 }
  0x1b   :  { %392 = vmatpush3.msra.mxu0 %v218_v16 }
  0x1c   :  { %393 = vmatprep.subr.mxu0 %v459_v0 }
  0x1d   :  { %394 = vmatpush3.msra.mxu0 %v217_v17 }
  0x1e   :  { %395 = vmatprep.subr.mxu0 %v459_v0 }
  0x1f   :  { %396 = vmatpush3.msra.mxu0 %v216_v18 }
  0xd8   :  { %v126_v12 = vpop.f32.mrf.mxu0 }
  0xd9   :  { %v127_v13 = vadd.f32 %v346_v11, %v126_v12 }
  0xda   :  { %v377_v14 = vpop.f32.mrf.mxu0 }
  0xdb   :  { %v130_v15 = vmax.f32 %v127_v13, 0.0 }
  0xdd   :  { %387 = vmatmul.mubr.msk.f32.vlgmr.msra.gmra.mxu1 %vm56_vm1, %v130_v15 }
 0x19d   :  { %v211_v20 = vpop.f32.mrf.mxu1 }
 0x19e   :  { %v212_v21 = vadd.f32 %v348_v19, %v211_v20 }
 0x19f   :  { %v388_v22 = vpop.f32.mrf.mxu1 }
 0x1a0   :  { %v215_v23 = vmax.f32 %v212_v21, 0.0 }
 0x1a2   :  { %398 = vmatmul.mubr.msk.f32.vlgmr.msra.gmra.mxu0 %vm56_vm1, %v215_v23 }
 0x262   :  { %v296_v27 = vpop.f32.mrf.mxu0 }
 0x263   :  { %v297_v29 = vadd.f32 %v350_v25, %v296_v27 }
 0x264   :  { %v399_v30 = vpop.f32.mrf.mxu0 }
 0x265   :  { %v301_v31 = vadd.f32 %v300_v28, %v297_v29 }
 0x267   :  { %v307_v32 = vsel %vm304_vm2, %v301_v31, -inf }
 0x268   :  { %v309_v33 = vsel %vm308_vm3, %v307_v32, -inf }
 0x269   :  { %v310_v34 = vrot.slane %v309_v33, 4 }
 0x26b   :  { %v311_v35 = vmax.f32 %v309_v33, %v310_v34 }
 0x26d   :  { %v312_v36 = vrot.slane %v311_v35, 2 }
 0x26f   :  { %v313_v37 = vmax.f32 %v311_v35, %v312_v36 }
 0x271   :  { %v314_v38 = vrot.slane %v313_v37, 1 }
 0x273   :  { %v315_v39 = vmax.f32 %v313_v37, %v314_v38 }
 0x275   :  { %v316_v40 = vsub.f32 %v307_v32, %v315_v39 }
 0x277   :  { %v317_v41 = vmul.f32 1.442695, %v316_v40 }
 0x279   :  { %408 = vpow2.f32 %v317_v41 }
 0x286   :  { %v409_v42 = vpop.eup %408 }
 0x287   :  { %v319_v43 = vsel %vm308_vm3, %v409_v42, 0.0 }
 0x288   :  { %v320_v44 = vrot.slane %v319_v43, 4 }
 0x28a   :  { %v321_v45 = vadd.f32 %v320_v44, %v319_v43 }
 0x28c   :  { %v322_v46 = vrot.slane %v321_v45, 2 }
 0x28e   :  { %v323_v47 = vadd.f32 %v322_v46, %v321_v45 }
 0x290   :  { %v324_v48 = vrot.slane %v323_v47, 1 }
 0x292   :  { %v325_v49 = vadd.f32 %v324_v48, %v323_v47 }
 0x294   :  { %410 = vrcp.f32 %v325_v49 }
 0x2a1   :  { %v411_v50 = vpop.eup %410 }
 0x2a2   :  { %v327_v51 = vmul.f32 %v411_v50, %v409_v42 }
 0x2a4   :  { %328 = vst.msk [vmem:[#allocation5] sm:$0xff] %vm308_vm3, %v327_v51 }
 0x2a5   :  { %333 = vsyncadd [#allocation4], 96  ;;  %s461_s4 = smov [#allocation5]  }
 0x2a6   :  { %s334_s6 = sshll.u32 %s461_s4, 4  ;;  %s335_s6 = int_to_ptr.vmem [resolvable:$true] %s334_s6 }
 0x2a7   :  { %s432_s7 = scalar_lea.vmem %s335_s6, 32  ;;  %s436_s11 = scalar_lea.vmem %s335_s6, 128 }
 0x2a8   :  { %p433_p5 = scmp.ne.s32.totalorder %s335_s6, %s432_s7  ;;  %p437_p6 = scmp.lt.s32.totalorder %s335_s6, %s335_s6 }
 0x2a9   :  { %p438_p7 = scmp.lt.s32.totalorder %s436_s11, %s432_s7 }
 0x2ab   :  { %p439_p8 = por %p438_p7, %p437_p6 }
 0x2ad   :  { %p440_p9 = pnand %p439_p8, %p433_p5 }
 0x2af   :  { %443 = shalt.err (!%p440_p9)
}
 0x2b0   :  { %s462_s12 = smov 32   ;;  %s463_s13 = smov 2  }
 0x2b1   :  { %340 = dma.vmem_to_hbm [thread:$0]  %s335_s6, 32, %s571_s8, [#allocation4], %s462_s12, %s462_s12, %s463_s13  }
 0x2b2   :  { %454 = dma.done.wait [#allocation4], 128  }
 0x2b3   :  { %455 = vsyncadd [#allocation4], 4294967168 }
 0x2b4   :  { %344 = vsyncpa [#allocation3], 1 }
 0x2b5   :  { %345 = vsyncpa [#allocation4], 1 }

</bundles_post_ra>
